<compile_context>
chip_gen: v5e
topology: v5e:2x2
jax: 0.10.0
libtpu: 0.0.40
codegen_flags: <defaults>
</compile_context>

<pallas_src>
import functools
import math

import jax
import jax.numpy as jnp
from jax import lax
from jax.experimental import pallas as pl
from jax.experimental.pallas import tpu as pltpu


# ----------------------------- kernels --------------------------------------


def _layernorm_kernel(x_ref, gamma_ref, beta_ref, o_ref, *, eps):
    """LayerNorm over the last dim of the block (one hidden vector per row).

    Centered two-pass variance (mean first, then E[(x-mean)^2]) for numerics
    close to torch.nn.LayerNorm; the op is HBM-bound so the extra pass over
    the in-VMEM tile is free.
    """
    x = x_ref[...].astype(jnp.float32)
    inv_h = 1.0 / float(x.shape[-1])
    mean = jnp.sum(x, axis=-1, keepdims=True) * inv_h
    xc = x - mean
    var = jnp.sum(xc * xc, axis=-1, keepdims=True) * inv_h
    inv = lax.rsqrt(var + eps)
    # gamma/beta arrive pre-cast to f32 and stay VMEM-resident across steps.
    o_ref[...] = (xc * inv * gamma_ref[...] + beta_ref[...]).astype(o_ref.dtype)


def _layernorm_fold_kernel(x_ref, gamma_ref, beta_ref, avg_ref, o_ref, *, eps):
    """Lane-dense folded LayerNorm: each block row packs fh//hidden hidden
    vectors (fh is a multiple of 128 lanes -> unmasked, full-width stores).

    avg_ref is the (fh, fh) block-diagonal averaging matrix (1/hidden on the
    diagonal blocks), built once in the wrapper and resident in VMEM (constant
    index_map), so no per-step iota/select reconstruction.  One fused MXU call
    computes the per-segment mean of x and of x*x AND broadcasts each
    statistic back to every lane of its segment.

    NOTE: rows are fully independent; the masked partial last block may run on
    stale rows whose (possibly Inf/NaN) results are discarded by the masked
    store — safe as long as no cross-row reduction is added here.  Variance is
    E[x^2]-E[x]^2 (clamped at 0); use the centered fold==1 kernel if bit-close
    torch matching is ever required.
    """
    x = x_ref[...].astype(jnp.float32)
    tr = x.shape[0]
    avg = avg_ref[...]
    if tr % 8 == 0:
        # Fused: a single (2*tr, fh) @ (fh, fh) matmul for both statistics.
        stats = jnp.dot(jnp.concatenate([x, x * x], axis=0), avg,
                        preferred_element_type=jnp.float32)
        mean_b = stats[:tr]
        ex2_b = stats[tr:]
    else:
        # Tiny / sublane-unaligned block: keep concat/slice offsets tile-safe.
        mean_b = jnp.dot(x, avg, preferred_element_type=jnp.float32)
        ex2_b = jnp.dot(x * x, avg, preferred_element_type=jnp.float32)
    var_b = jnp.maximum(ex2_b - mean_b * mean_b, 0.0)
    inv_b = lax.rsqrt(var_b + eps)
    o_ref[...] = ((x - mean_b) * inv_b * gamma_ref[...]
                  + beta_ref[...]).astype(o_ref.dtype)


# ----------------------------- wrapper --------------------------------------


@functools.lru_cache(maxsize=None)
def _vmem_budgets():
    """(block byte budget, vmem_limit_bytes), sized per TPU generation.

    Conservative (v7x-safe: 64 MiB VMEM per TensorCore) by default; bumped
    when a 128 MiB-VMEM part (v5e / v6e) is positively detected.
    """
    block_budget = 24 * 1024 * 1024
    vmem_limit = 40 * 1024 * 1024
    try:
        info = pltpu.get_tpu_info()
        cap = None
        for attr in ("vmem_capacity_bytes", "vmem_bytes", "vmem_size_bytes"):
            cap = getattr(info, attr, None)
            if cap is not None:
                break
        if cap is not None and int(cap) >= 100 * 1024 * 1024:
            block_budget = 48 * 1024 * 1024
            vmem_limit = 96 * 1024 * 1024
    except Exception:
        pass  # stay conservative if the query is unavailable
    return block_budget, vmem_limit


def layernorm_pallas(x: jax.Array, gamma: jax.Array, beta: jax.Array,
                     eps: float = 1e-5) -> jax.Array:
    """LayerNorm over the last dim of x (any leading dims), Pallas TPU kernel."""
    orig_shape = x.shape
    hidden = int(orig_shape[-1])
    rows = 1
    for d in orig_shape[:-1]:
        rows *= int(d)

    # Lane-dense folding: pack `fold` hidden vectors per kernel row so the
    # block's last dim (fh = lcm(hidden, 128)) is a multiple of 128 lanes ->
    # unmasked full-width stores.  Capped at fh <= 512 so the segment-stats
    # matmul stays hidden under the HBM bound on all generations.
    fold = 1
    if hidden < 128:
        f = math.lcm(hidden, 128) // hidden
        if f * hidden <= 512 and rows % f == 0:
            fold = f
        # TODO(synk): when rows % fold != 0 we fall back to the masked fold==1
        # path; a small remainder pallas_call would keep lane-dense stores.
    rows_f = rows // fold
    fh = fold * hidden

    itemsize = x.dtype.itemsize
    # Bytes per block row: double-buffered input + output blocks plus ~4 f32
    # working copies from the in-kernel f32 upcast (x, x*x / centered copy,
    # stats result, y) -- matters for bf16/int8 inputs under v7x's 64 MiB VMEM.
    per_row_bytes = fh * (2 * itemsize + 2 * itemsize + 4 * 4)
    sub = max(8, 32 // max(1, itemsize))        # dtype-dependent sublane multiple
    block_budget, vmem_limit = _vmem_budgets()
    tr = max(sub, (block_budget // per_row_bytes) // sub * sub)
    if tr >= rows_f:
        # Whole array fits in one block: still split into >=2 blocks when
        # possible so dimension_semantics=("parallel",) can shard the row axis
        # across both TensorCores on v7x (one extra ~0.35us step on 1-TC chips).
        half = ((rows_f // 2 + sub - 1) // sub) * sub
        tr = half if (sub <= half < rows_f) else rows_f
    grid = (pl.cdiv(rows_f, tr),)               # partial last block is masked

    x2 = x.reshape(rows_f, fh)
    g2 = jnp.tile(gamma.astype(jnp.float32).reshape(1, hidden), (1, fold))
    b2 = jnp.tile(beta.astype(jnp.float32).reshape(1, fold * 0 + hidden), (1, fold))

    cparams = pltpu.CompilerParams(
        dimension_semantics=("parallel",),      # shard rows across TCs (v7x)
        vmem_limit_bytes=vmem_limit,
    )

    if fold > 1:
        seg = jnp.arange(fh, dtype=jnp.int32) // hidden
        avg = jnp.where(seg[:, None] == seg[None, :],
                        1.0 / hidden, 0.0).astype(jnp.float32)
        out = pl.pallas_call(
            functools.partial(_layernorm_fold_kernel, eps=eps),
            out_shape=jax.ShapeDtypeStruct((rows_f, fh), x.dtype),
            grid_spec=pltpu.PrefetchScalarGridSpec(
                num_scalar_prefetch=0,
                grid=grid,
                in_specs=[
                    pl.BlockSpec((tr, fh), lambda i: (i, 0)),
                    pl.BlockSpec((1, fh), lambda i: (0, 0)),   # gamma: resident
                    pl.BlockSpec((1, fh), lambda i: (0, 0)),   # beta:  resident
                    pl.BlockSpec((fh, fh), lambda i: (0, 0)),  # avg:   resident
                ],
                out_specs=pl.BlockSpec((tr, fh), lambda i: (i, 0)),
            ),
            compiler_params=cparams,
        )(x2, g2, b2, avg)
    else:
        out = pl.pallas_call(
            functools.partial(_layernorm_kernel, eps=eps),
            out_shape=jax.ShapeDtypeStruct((rows_f, fh), x.dtype),
            grid_spec=pltpu.PrefetchScalarGridSpec(
                num_scalar_prefetch=0,
                grid=grid,
                in_specs=[
                    pl.BlockSpec((tr, fh), lambda i: (i, 0)),
                    pl.BlockSpec((1, fh), lambda i: (0, 0)),   # gamma: resident
                    pl.BlockSpec((1, fh), lambda i: (0, 0)),   # beta:  resident
                ],
                out_specs=pl.BlockSpec((tr, fh), lambda i: (i, 0)),
            ),
            compiler_params=cparams,
        )(x2, g2, b2)
    return out.reshape(orig_shape)


# ----------------------------- modules --------------------------------------


class PallasLayerNorm:
    """Pallas-TPU LayerNorm over the last dim (the layer TP-MANN wraps)."""

    def __init__(self, hidden: int, gamma: jax.Array | None = None,
                 beta: jax.Array | None = None, eps: float = 1e-5):
        self.eps = eps
        self.gamma = gamma if gamma is not None else jnp.ones((hidden,), jnp.float32)
        self.beta = beta if beta is not None else jnp.zeros((hidden,), jnp.float32)

    def __call__(self, x: jax.Array) -> jax.Array:
        return layernorm_pallas(x, self.gamma, self.beta, eps=self.eps)


class OptionalLayer:
    """Pallas analogue of TP-MANN's OptionalLayer: applies `layer` iff active."""

    def __init__(self, layer, active: bool = False):
        self.layer = layer
        self.active = active

    def __call__(self, x: jax.Array) -> jax.Array:
        if self.active:
            return self.layer(x)
        # Inactive path: `active` is a Python bool resolved at trace time, so
        # returning x unchanged is exactly the PyTorch semantics and costs nothing.
        return x


# ----------------------------- reference & main ------------------------------


def _layernorm_ref(x, gamma, beta, eps=1e-5):
    mean = jnp.mean(x, axis=-1, keepdims=True)
    var = jnp.mean((x - mean) ** 2, axis=-1, keepdims=True)
    return (x - mean) / jnp.sqrt(var + eps) * gamma + beta


if __name__ == "__main__":
    key = jax.random.PRNGKey(0)
    ks = list(jax.random.split(key, 9))

    # Case 1: small hidden (H=32) -> lane-dense folded path (fold=4, fh=128).
    B, S, H = 2, 16, 32
    x = jax.random.normal(ks[0], (B, S, H), dtype=jnp.float32)
    gamma = jax.random.normal(ks[1], (H,), dtype=jnp.float32)
    beta = jax.random.normal(ks[2], (H,), dtype=jnp.float32)
    ln = PallasLayerNorm(H, gamma=gamma, beta=beta)
    layer_on = OptionalLayer(ln, active=True)
    y_on = jax.block_until_ready(layer_on(x))
    assert jnp.allclose(y_on, _layernorm_ref(x, gamma, beta),
                        atol=1e-4, rtol=1e-4), "active path mismatch (H=32)"

    layer_off = OptionalLayer(ln, active=False)
    y_off = jax.block_until_ready(layer_off(x))
    assert jnp.allclose(y_off, x), "inactive path mismatch"

    # Case 2: H=256, uneven row count (rows=18) -> fold=1 path, >=2 grid steps
    # with a masked partial last block.
    B2, S2, H2 = 2, 9, 256
    x2 = jax.random.normal(ks[3], (B2, S2, H2), dtype=jnp.float32)
    g2 = jax.random.normal(ks[4], (H2,), dtype=jnp.float32)
    b2 = jax.random.normal(ks[5], (H2,), dtype=jnp.float32)
    y2 = jax.block_until_ready(layernorm_pallas(x2, g2, b2))
    assert jnp.allclose(y2, _layernorm_ref(x2, g2, b2),
                        atol=1e-4, rtol=1e-4), "active path mismatch (H=256)"

    # Case 3: H=48 -> generalized lcm fold (fold=8, fh=384).
    B3, S3, H3 = 2, 8, 48
    x3 = jax.random.normal(ks[6], (B3, S3, H3), dtype=jnp.float32)
    g3 = jax.random.normal(ks[7], (H3,), dtype=jnp.float32)
    b3 = jax.random.normal(ks[8], (H3,), dtype=jnp.float32)
    y3 = jax.block_until_ready(layernorm_pallas(x3, g3, b3))
    assert jnp.allclose(y3, _layernorm_ref(x3, g3, b3),
                        atol=1e-4, rtol=1e-4), "active path mismatch (H=48)"

    print("KERNEL_OK")
</pallas_src>

<mosaic_0001>
module attributes {stable_mosaic.version = 11 : i64} {
  func.func @_layernorm_fold_kernel(%arg0: i32, %arg1: memref<8x128xf32, #tpu.memory_space<vmem>>, %arg2: memref<1x128xf32, #tpu.memory_space<vmem>>, %arg3: memref<1x128xf32, #tpu.memory_space<vmem>>, %arg4: memref<128x128xf32, #tpu.memory_space<vmem>>, %arg5: memref<8x128xf32, #tpu.memory_space<vmem>>) attributes {dimension_semantics = [#tpu.dimension_semantics<parallel>], iteration_bounds = array<i64: 1>, scalar_prefetch = 0 : i64, scratch_operands = 0 : i64, tpu.core_type = #tpu.core_type<tc>, window_params = [{transform_indices = @transform_0, window_bounds = array<i64: 8, 128>}, {pipeline_mode = #tpu.pipeline_mode<synchronous>, transform_indices = @transform_1, window_bounds = array<i64: 1, 128>}, {pipeline_mode = #tpu.pipeline_mode<synchronous>, transform_indices = @transform_2, window_bounds = array<i64: 1, 128>}, {pipeline_mode = #tpu.pipeline_mode<synchronous>, transform_indices = @transform_3, window_bounds = array<i64: 128, 128>}, {transform_indices = @transform_4, window_bounds = array<i64: 8, 128>}]} {
    %c0 = arith.constant 0 : index
    %c0_0 = arith.constant 0 : index
    %0 = vector.load %arg1[%c0, %c0_0] : memref<8x128xf32, #tpu.memory_space<vmem>>, vector<8x128xf32>
    %c0_1 = arith.constant 0 : index
    %c0_2 = arith.constant 0 : index
    %1 = vector.load %arg4[%c0_1, %c0_2] : memref<128x128xf32, #tpu.memory_space<vmem>>, vector<128x128xf32>
    %2 = arith.mulf %0, %0 : vector<8x128xf32>
    %3 = tpu.concatenate %0, %2 in 0 : vector<8x128xf32>, vector<8x128xf32> -> vector<16x128xf32>
    %cst = arith.constant dense<0.000000e+00> : vector<16x128xf32>
    %4 = tpu.matmul %3, %1, %cst {dimension_numbers = #tpu.dot_dimension_numbers<[1], [0], [0], [1], [0, 0, 1, 1], [], []>} : vector<16x128xf32>, vector<128x128xf32>, vector<16x128xf32> -> vector<16x128xf32>
    %5 = vector.extract_strided_slice %4 {offsets = [0, 0], sizes = [8, 128], strides = [1, 1]} : vector<16x128xf32> to vector<8x128xf32>
    %6 = vector.extract_strided_slice %4 {offsets = [8, 0], sizes = [8, 128], strides = [1, 1]} : vector<16x128xf32> to vector<8x128xf32>
    %7 = arith.mulf %5, %5 : vector<8x128xf32>
    %8 = arith.subf %6, %7 : vector<8x128xf32>
    %cst_3 = arith.constant 0.000000e+00 : f32
    %9 = vector.broadcast %cst_3 : f32 to vector<8x128xf32>
    %10 = arith.maximumf %8, %9 : vector<8x128xf32>
    %cst_4 = arith.constant 9.99999974E-6 : f32
    %11 = vector.broadcast %cst_4 : f32 to vector<8x128xf32>
    %12 = arith.addf %10, %11 : vector<8x128xf32>
    %13 = math.rsqrt %12 : vector<8x128xf32>
    %14 = arith.subf %0, %5 : vector<8x128xf32>
    %15 = arith.mulf %14, %13 : vector<8x128xf32>
    %c0_5 = arith.constant 0 : index
    %c0_6 = arith.constant 0 : index
    %16 = vector.load %arg2[%c0_5, %c0_6] : memref<1x128xf32, #tpu.memory_space<vmem>>, vector<1x128xf32>
    %17 = vector.broadcast %16 : vector<1x128xf32> to vector<8x128xf32>
    %18 = arith.mulf %15, %17 : vector<8x128xf32>
    %c0_7 = arith.constant 0 : index
    %c0_8 = arith.constant 0 : index
    %19 = vector.load %arg3[%c0_7, %c0_8] : memref<1x128xf32, #tpu.memory_space<vmem>>, vector<1x128xf32>
    %20 = vector.broadcast %19 : vector<1x128xf32> to vector<8x128xf32>
    %21 = arith.addf %18, %20 : vector<8x128xf32>
    %c0_9 = arith.constant 0 : index
    %c0_10 = arith.constant 0 : index
    %22 = vector.load %arg5[%c0_9, %c0_10] : memref<8x128xf32, #tpu.memory_space<vmem>>, vector<8x128xf32>
    tpu.vector_store %arg5[%c0_9, %c0_10], %21 {strides = array<i32>} : memref<8x128xf32, #tpu.memory_space<vmem>>, vector<8x128xf32>,
    return
  }
  func.func @transform_0(%arg0: i32) -> (i32, i32) {
    %c0_i32 = arith.constant 0 : i32
    %c0_i32_0 = arith.constant 0 : i32
    return %arg0, %c0_i32 : i32, i32
  }
  func.func @transform_1(%arg0: i32) -> (i32, i32) {
    %c0_i32 = arith.constant 0 : i32
    %c0_i32_0 = arith.constant 0 : i32
    %c0_i32_1 = arith.constant 0 : i32
    return %c0_i32, %c0_i32_0 : i32, i32
  }
  func.func @transform_2(%arg0: i32) -> (i32, i32) {
    %c0_i32 = arith.constant 0 : i32
    %c0_i32_0 = arith.constant 0 : i32
    %c0_i32_1 = arith.constant 0 : i32
    return %c0_i32, %c0_i32_0 : i32, i32
  }
  func.func @transform_3(%arg0: i32) -> (i32, i32) {
    %c0_i32 = arith.constant 0 : i32
    %c0_i32_0 = arith.constant 0 : i32
    %c0_i32_1 = arith.constant 0 : i32
    return %c0_i32, %c0_i32_0 : i32, i32
  }
  func.func @transform_4(%arg0: i32) -> (i32, i32) {
    %c0_i32 = arith.constant 0 : i32
    %c0_i32_0 = arith.constant 0 : i32
    return %arg0, %c0_i32 : i32, i32
  }
}

</mosaic_0001>

<bundles_post_ra>
// kernel: tpu_custom_call.1
= control target key start
LH: loop header
LB: loop body
LE: loop exit
PB: predicated region body
PF: predicated region fallthrough
CT: control target
= control target key end

     0   :  { %9 = vsyncpa [#allocation3], 0  ;;  %s321_s0 = inlined_call_operand.hbm [shape: f32[8,128], index: 0, kind: input, shape index: {}]   ;;  %s322_s1 = inlined_call_operand.hbm [shape: f32[1,128], index: 1, kind: input, shape index: {}]   ;;  %s323_s2 = inlined_call_operand.vmem [shape: f32[1,128], index: 2, kind: input, shape index: {}]   ;;  %s324_s3 = inlined_call_operand.hbm [shape: f32[128,128], index: 3, kind: input, shape index: {}]   ;;  %s325_s4 = inlined_call_operand.hbm [shape: f32[8,128], index: 4, kind: output, shape index: {}]  }
   0x1   :  { %10 = vsyncpa [#allocation6], 0  ;;  %s28_s17 = sshll.u32 %s322_s1, 4  ;;  %s29_s17 = int_to_ptr.hbm [resolvable:$true] %s28_s17 }
   0x2   :  { %11 = vsyncpa [#allocation4], 0  ;;  %s275_s18 = smov [#allocation5]   ;;  %s17_s22 = sshll.u32 %s321_s0, 4  ;;  %s18_s22 = int_to_ptr.hbm [resolvable:$true] %s17_s22 }
   0x3   :  { %s30_s19 = sshll.u32 %s275_s18, 4  ;;  %s276_s23 = smov [#allocation2]   ;;  %s31_s19 = int_to_ptr.vmem [resolvable:$true] %s30_s19 }
   0x4   :  { %33 = dma.hbm_to_vmem [thread:$0]  %s29_s17, 16, %s31_s19, [#allocation6]  }
   0x5   :  { %s19_s24 = sshll.u32 %s276_s23, 4  ;;  %s40_s27 = sshll.u32 %s324_s3, 4  ;;  %s20_s24 = int_to_ptr.vmem [resolvable:$true] %s19_s24  ;;  %s41_s27 = int_to_ptr.hbm [resolvable:$true] %s40_s27 }
   0x6   :  { %22 = dma.hbm_to_vmem [thread:$0]  %s18_s22, 128, %s20_s24, [#allocation3]  }
   0x7   :  { %s277_s1 = smov [#allocation7]   ;;  %s278_s29 = smov 128  }
   0x8   :  { %s42_s28 = sshll.u32 %s277_s1, 4  ;;  %s279_s30 = smov 8   ;;  %s43_s28 = int_to_ptr.vmem [resolvable:$true] %s42_s28 }
   0x9   :  { %48 = dma.hbm_to_vmem [thread:$0]  %s41_s27, 2048, %s43_s28, [#allocation6], %s278_s29, %s278_s29, %s279_s30  }
   0xa   :  { %269 = dma.done.wait [#allocation3], 128  }
   0xb   :  { %270 = vsyncadd [#allocation3], 4294967168 }
   0xc   :  { %271 = dma.done.wait [#allocation6], 2064  }
   0xd   :  { %272 = vsyncadd [#allocation6], 4294965232  ;;  %v77_v0 = vld [vmem:[#allocation7 + $0x78] sm:$0xff]  ;;  %v76_v1 = vld [vmem:[#allocation7 + $0x70] sm:$0xff]  ;;  %s280_s5 = smov [#allocation8]   ;;  %s136_s9 = sshll.u32 %s325_s4, 4  ;;  %s137_s9 = int_to_ptr.hbm [resolvable:$true] %s136_s9 }
   0xe   :  { %79 = vmatpush.msra.mxu0 %v77_v0  ;;  %147 = vmatpush.msra.mxu1 %v77_v0  ;;  %v75_v2 = vld [vmem:[#allocation7 + $0x68] sm:$0xff]  ;;  %v74_v3 = vld [vmem:[#allocation7 + $0x60] sm:$0xff]  ;;  %v73_v4 = vld [vmem:[#allocation7 + $0x58] sm:$0xff]  ;;  %s134_s6 = sshll.u32 %s280_s5, 4  ;;  %s135_s6 = int_to_ptr.vmem [resolvable:$true] %s134_s6 }
   0xf   :  { %v72_v5 = vld [vmem:[#allocation7 + $0x50] sm:$0xff]  ;;  %v71_v6 = vld [vmem:[#allocation7 + $0x48] sm:$0xff]  ;;  %v70_v7 = vld [vmem:[#allocation7 + $0x40] sm:$0xff] }
  0x10   :  { %80 = vmatpush.msra.mxu0 %v76_v1  ;;  %148 = vmatpush.msra.mxu1 %v76_v1  ;;  %v69_v8 = vld [vmem:[#allocation7 + $0x38] sm:$0xff]  ;;  %v68_v9 = vld [vmem:[#allocation7 + $0x30] sm:$0xff]  ;;  %v67_v10 = vld [vmem:[#allocation7 + $0x28] sm:$0xff] }
  0x11   :  { %v66_v11 = vld [vmem:[#allocation7 + $0x20] sm:$0xff]  ;;  %v65_v12 = vld [vmem:[#allocation7 + $0x18] sm:$0xff]  ;;  %v64_v13 = vld [vmem:[#allocation7 + $0x10] sm:$0xff] }
  0x12   :  { %81 = vmatpush.msra.mxu0 %v75_v2  ;;  %149 = vmatpush.msra.mxu1 %v75_v2  ;;  %v61_v14 = vld [vmem:[#allocation2] sm:$0xff]  ;;  %v63_v15 = vld [vmem:[#allocation7 + $0x8] sm:$0xff]  ;;  %v62_v16 = vld [vmem:[#allocation7] sm:$0xff] }
  0x13   :  { %v78_v17 = vmul.f32 %v61_v14, %v61_v14  ;;  %v169_v31 = vld [vmem:[#allocation5] ss:$0 sm:$0xff]  ;;  %v170_v34 = vld [vmem:[%s323_s2] ss:$0 sm:$0xff] }
  0x14   :  { %82 = vmatpush.msra.mxu0 %v74_v3  ;;  %150 = vmatpush.msra.mxu1 %v74_v3 }
  0x16   :  { %83 = vmatpush.msra.mxu0 %v73_v4  ;;  %151 = vmatpush.msra.mxu1 %v73_v4 }
  0x18   :  { %84 = vmatpush.msra.mxu0 %v72_v5  ;;  %152 = vmatpush.msra.mxu1 %v72_v5 }
  0x1a   :  { %85 = vmatpush.msra.mxu0 %v71_v6  ;;  %153 = vmatpush.msra.mxu1 %v71_v6 }
  0x1c   :  { %86 = vmatpush.msra.mxu0 %v70_v7  ;;  %154 = vmatpush.msra.mxu1 %v70_v7 }
  0x1e   :  { %87 = vmatpush.msra.mxu0 %v69_v8  ;;  %155 = vmatpush.msra.mxu1 %v69_v8 }
  0x20   :  { %88 = vmatpush.msra.mxu0 %v68_v9  ;;  %156 = vmatpush.msra.mxu1 %v68_v9 }
  0x22   :  { %89 = vmatpush.msra.mxu0 %v67_v10  ;;  %157 = vmatpush.msra.mxu1 %v67_v10 }
  0x24   :  { %90 = vmatpush.msra.mxu0 %v66_v11  ;;  %158 = vmatpush.msra.mxu1 %v66_v11 }
  0x26   :  { %91 = vmatpush.msra.mxu0 %v65_v12  ;;  %159 = vmatpush.msra.mxu1 %v65_v12 }
  0x28   :  { %92 = vmatpush.msra.mxu0 %v64_v13  ;;  %160 = vmatpush.msra.mxu1 %v64_v13 }
  0x2a   :  { %93 = vmatpush.msra.mxu0 %v63_v15  ;;  %161 = vmatpush.msra.mxu1 %v63_v15 }
  0x2c   :  { %94 = vmatpush.msra.mxu0 %v62_v16  ;;  %162 = vmatpush.msra.mxu1 %v62_v16 }
  0x2d   :  { %95 = vmatmul.f32.vlgmr.msra.gmra.mxu0 %v61_v14  ;;  %98 = vmatmul.f32.vlgmr.msra.gmra.mxu1 %v78_v17 }
  0xaa   :  { %v96_v18 = vpop.f32.mrf.mxu0  ;;  %v99_v19 = vpop.f32.mrf.mxu1 }
  0xab   :  { %v102_v20 = vmul.f32 %v96_v18, %v96_v18  ;;  %v116_v30 = vsub.f32 %v61_v14, %v96_v18 }
  0xad   :  { %v103_v21 = vsub.f32 %v99_v19, %v102_v20 }
  0xaf   :  { %v104_v22 = vmax.f32 %v103_v21, 0.0 }
  0xb1   :  { %v105_v23 = vadd.f32 1e-05, %v104_v22 }
  0xb3   :  { %171 = vrsqrt.f32 %v105_v23  ;;  %vm112_vm1 = vweird.f32 %v105_v23 }
  0xb9   :  { %v172_v24 = vpop.eup %171 }
  0xba   :  { %v107_v25 = vmul.f32 %v172_v24, %v105_v23  ;;  %vm113_vm0 = vweird.f32 %v172_v24 }
  0xbb   :  { %vm114_vm2 = vmor %vm112_vm1, %vm113_vm0 }
  0xbc   :  { %v108_v26 = vmul.f32 %v172_v24, %v107_v25 }
  0xbe   :  { %v109_v27 = vmul.f32 0.5, %v108_v26 }
  0xc0   :  { %v110_v28 = vsub.f32 1.5, %v109_v27 }
  0xc2   :  { %v111_v29 = vmul.f32 %v172_v24, %v110_v28 }
  0xc4   :  { %v115_v32 = vsel %vm114_vm2, %v172_v24, %v111_v29 }
  0xc5   :  { %v117_v33 = vmul.f32 %v116_v30, %v115_v32 }
  0xc7   :  { %v122_v35 = vmul.f32 %v169_v31, %v117_v33 }
  0xc9   :  { %v127_v36 = vadd.f32 %v170_v34, %v122_v35 }
  0xcb   :  { %128 = vst [vmem:[#allocation8] sm:$0xff] %v127_v36 }
  0xcc   :  { %139 = dma.vmem_to_hbm [thread:$0]  %s135_s6, 128, %s137_s9, [#allocation4]  }
  0xcd   :  { %273 = dma.done.wait [#allocation4], 128  }
  0xce   :  { %274 = vsyncadd [#allocation4], 4294967168 }
  0xcf   :  { %144 = vsyncpa [#allocation3], 1 }
  0xd0   :  { %145 = vsyncpa [#allocation6], 1 }
  0xd1   :  { %146 = vsyncpa [#allocation4], 1 }

</bundles_post_ra>
